<compile_context>
chip_gen: v7x
topology: tpu7x:2x2x1
jax: 0.10.0
libtpu: 0.0.40
codegen_flags: <defaults>
</compile_context>

<pallas_src>
import jax
import jax.numpy as jnp
from jax.experimental import pallas as pl
from jax.experimental.pallas import tpu as pltpu


# ----------------------------- config (toy sizes) ----------------------------
HIDDEN = 32
INTERMEDIATE = 4 * HIDDEN          # 128
LAYER_NORM_EPS = 1e-12
BATCH = 2
SEQ = 8

ROW_TILE_CAP = 512                 # rows per grid step at production sizes


# ----------------------------- kernel ----------------------------------------
def blip_text_output_kernel(hs_ref, res_ref, w_ref, b_ref, g_ref, beta_ref, out_ref):
    """Fused dense -> (dropout=identity) -> residual add -> LayerNorm for one row tile.

    Shapes per grid step:
      hs_ref   : (T, I)  bf16   intermediate activations (row tile)
      res_ref  : (T, H)  bf16   residual input_tensor (row tile)
      w_ref    : (I, H)  bf16   dense weight, pre-transposed (VMEM-resident across steps)
      b_ref    : (1, H)  f32    dense bias
      g_ref    : (1, H)  f32    LayerNorm gamma
      beta_ref : (1, H)  f32    LayerNorm beta
      out_ref  : (T, H)
    """
    # dense: y = x @ W + b   (bf16 MXU inputs, f32 accumulation)
    y = jnp.dot(hs_ref[...], w_ref[...], preferred_element_type=jnp.float32) + b_ref[...]

    # dropout is identity at inference; residual add in f32
    z = y + res_ref[...].astype(jnp.float32)

    # LayerNorm over hidden dim, single-pass statistics in f32
    mean = jnp.mean(z, axis=-1, keepdims=True)
    mean_sq = jnp.mean(z * z, axis=-1, keepdims=True)
    var = mean_sq - mean * mean
    normed = (z - mean) * jax.lax.rsqrt(var + LAYER_NORM_EPS)

    out_ref[...] = (normed * g_ref[...] + beta_ref[...]).astype(out_ref.dtype)


# ----------------------------- wrapper ----------------------------------------
def _pick_row_tile(m, cap=ROW_TILE_CAP):
    """Largest multiple-of-8 divisor of m that is <= cap; fall back to full m."""
    for t in range(min(m, cap), 0, -1):
        if m % t == 0 and t % 8 == 0:
            return t
    return m


def blip_text_output(hidden_states, input_tensor, params):
    """BlipTextOutput.forward.

    hidden_states : (B, S, intermediate_size)
    input_tensor  : (B, S, hidden_size)
    returns       : (B, S, hidden_size), dtype follows input_tensor
    """
    B, S, I = hidden_states.shape
    H = input_tensor.shape[-1]
    M = B * S
    T = _pick_row_tile(M)
    grid = (M // T,)

    # Fold batch into the row (sublane) dimension; bf16 at the DMA boundary.
    hs2d = hidden_states.reshape(M, I).astype(jnp.bfloat16)
    res2d = input_tensor.reshape(M, H).astype(jnp.bfloat16)
    w_bf16 = params["w"].astype(jnp.bfloat16)

    # Per-channel vectors stay f32 and 2-D for clean sublane broadcast.
    b2d = params["b"].reshape(1, H).astype(jnp.float32)
    g2d = params["gamma"].reshape(1, H).astype(jnp.float32)
    beta2d = params["beta"].reshape(1, H).astype(jnp.float32)

    out_dtype = input_tensor.dtype

    cost = pl.CostEstimate(
        flops=2 * M * I * H + 10 * M * H,
        transcendentals=M,
        bytes_accessed=(M * I + M * H + I * H) * 2 + M * H * jnp.dtype(out_dtype).itemsize,
    )

    out2d = pl.pallas_call(
        blip_text_output_kernel,
        out_shape=jax.ShapeDtypeStruct((M, H), out_dtype),
        grid=grid,
        in_specs=[
            pl.BlockSpec((T, I), lambda i: (i, 0)),   # hidden_states row tile
            pl.BlockSpec((T, H), lambda i: (i, 0)),   # residual row tile
            pl.BlockSpec((I, H), lambda i: (0, 0)),   # weight, VMEM-resident
            pl.BlockSpec((1, H), lambda i: (0, 0)),   # bias
            pl.BlockSpec((1, H), lambda i: (0, 0)),   # gamma
            pl.BlockSpec((1, H), lambda i: (0, 0)),   # beta
        ],
        out_specs=pl.BlockSpec((T, H), lambda i: (i, 0)),
        compiler_params=pltpu.CompilerParams(dimension_semantics=("parallel",)),
        cost_estimate=cost,
    )(hs2d, res2d, w_bf16, b2d, g2d, beta2d)

    return out2d.reshape(B, S, H)


# ----------------------------- references (pure JAX) ---------------------------
def _ln_ref(z, gamma, beta):
    mean = jnp.mean(z, axis=-1, keepdims=True)
    var = jnp.mean((z - mean) ** 2, axis=-1, keepdims=True)
    return (z - mean) * jax.lax.rsqrt(var + LAYER_NORM_EPS) * gamma + beta


def blip_text_output_ref_f32(hidden_states, input_tensor, params):
    y = jnp.einsum("bsi,ih->bsh", hidden_states, params["w"]) + params["b"]
    return _ln_ref(y + input_tensor, params["gamma"], params["beta"])


def blip_text_output_ref_bf16_inputs(hidden_states, input_tensor, params):
    """Reference with the same bf16 input rounding the kernel applies, f32 math."""
    hs = hidden_states.astype(jnp.bfloat16).astype(jnp.float32)
    res = input_tensor.astype(jnp.bfloat16).astype(jnp.float32)
    w = params["w"].astype(jnp.bfloat16).astype(jnp.float32)
    y = jnp.einsum("bsi,ih->bsh", hs, w) + params["b"]
    return _ln_ref(y + res, params["gamma"], params["beta"])


def init_params(key):
    kw, = jax.random.split(key, 1)
    s = 0.02
    return {
        # pre-transposed nn.Linear weight: (in_features, out_features)
        "w": s * jax.random.normal(kw, (INTERMEDIATE, HIDDEN), jnp.float32),
        "b": jnp.zeros((HIDDEN,), jnp.float32),
        "gamma": jnp.ones((HIDDEN,), jnp.float32),
        "beta": jnp.zeros((HIDDEN,), jnp.float32),
    }


if __name__ == "__main__":
    key = jax.random.PRNGKey(0)
    k_hs, k_res, k_p = jax.random.split(key, 3)

    hidden_states = jax.random.normal(k_hs, (BATCH, SEQ, INTERMEDIATE), jnp.float32)
    input_tensor = jax.random.normal(k_res, (BATCH, SEQ, HIDDEN), jnp.float32)
    params = init_params(k_p)

    out = blip_text_output(hidden_states, input_tensor, params)
    out = jax.block_until_ready(out)

    assert out.shape == (BATCH, SEQ, HIDDEN)
    assert out.dtype == input_tensor.dtype
    assert jnp.all(jnp.isfinite(out))

    # Tight check against a reference with identical bf16 input rounding.
    ref_bf16 = blip_text_output_ref_bf16_inputs(hidden_states, input_tensor, params)
    assert jnp.allclose(out, ref_bf16, rtol=1e-4, atol=1e-4)

    # Loose check against the pure f32 PyTorch-equivalent reference.
    ref_f32 = blip_text_output_ref_f32(hidden_states, input_tensor, params)
    assert jnp.allclose(out, ref_f32, rtol=3e-2, atol=3e-2)

    print("KERNEL_OK")
</pallas_src>

<mosaic_0001>
module attributes {stable_mosaic.version = 11 : i64} {
  func.func @blip_text_output_kernel(%arg0: i32, %arg1: memref<16x128xbf16, #tpu.memory_space<vmem>>, %arg2: memref<16x32xbf16, #tpu.memory_space<vmem>>, %arg3: memref<128x32xbf16, #tpu.memory_space<vmem>>, %arg4: memref<1x32xf32, #tpu.memory_space<vmem>>, %arg5: memref<1x32xf32, #tpu.memory_space<vmem>>, %arg6: memref<1x32xf32, #tpu.memory_space<vmem>>, %arg7: memref<16x32xf32, #tpu.memory_space<vmem>>) attributes {dimension_semantics = [#tpu.dimension_semantics<parallel>], iteration_bounds = array<i64: 1>, scalar_prefetch = 0 : i64, scratch_operands = 0 : i64, tpu.core_type = #tpu.core_type<tc>, window_params = [{transform_indices = @transform_0, window_bounds = array<i64: 16, 128>}, {transform_indices = @transform_1, window_bounds = array<i64: 16, 32>}, {pipeline_mode = #tpu.pipeline_mode<synchronous>, transform_indices = @transform_2, window_bounds = array<i64: 128, 32>}, {pipeline_mode = #tpu.pipeline_mode<synchronous>, transform_indices = @transform_3, window_bounds = array<i64: 1, 32>}, {pipeline_mode = #tpu.pipeline_mode<synchronous>, transform_indices = @transform_4, window_bounds = array<i64: 1, 32>}, {pipeline_mode = #tpu.pipeline_mode<synchronous>, transform_indices = @transform_5, window_bounds = array<i64: 1, 32>}, {transform_indices = @transform_6, window_bounds = array<i64: 16, 32>}]} {
    %c0 = arith.constant 0 : index
    %c0_0 = arith.constant 0 : index
    %0 = vector.load %arg1[%c0, %c0_0] : memref<16x128xbf16, #tpu.memory_space<vmem>>, vector<16x128xbf16>
    %c0_1 = arith.constant 0 : index
    %c0_2 = arith.constant 0 : index
    %1 = vector.load %arg3[%c0_1, %c0_2] : memref<128x32xbf16, #tpu.memory_space<vmem>>, vector<128x32xbf16>
    %cst = arith.constant dense<0.000000e+00> : vector<16x32xf32>
    %2 = tpu.matmul %0, %1, %cst {dimension_numbers = #tpu.dot_dimension_numbers<[1], [0], [0], [1], [0, 0, 1, 1], [], []>} : vector<16x128xbf16>, vector<128x32xbf16>, vector<16x32xf32> -> vector<16x32xf32>
    %c0_3 = arith.constant 0 : index
    %c0_4 = arith.constant 0 : index
    %3 = vector.load %arg4[%c0_3, %c0_4] : memref<1x32xf32, #tpu.memory_space<vmem>>, vector<1x32xf32>
    %4 = vector.broadcast %3 : vector<1x32xf32> to vector<16x32xf32>
    %5 = arith.addf %2, %4 : vector<16x32xf32>
    %c0_5 = arith.constant 0 : index
    %c0_6 = arith.constant 0 : index
    %6 = vector.load %arg2[%c0_5, %c0_6] : memref<16x32xbf16, #tpu.memory_space<vmem>>, vector<16x32xbf16>
    %7 = arith.extf %6 : vector<16x32xbf16> to vector<16x32xf32>
    %8 = arith.addf %5, %7 : vector<16x32xf32>
    %cst_7 = arith.constant dense<0.000000e+00> : vector<16xf32>
    %9 = vector.multi_reduction <add>, %8, %cst_7 [1] : vector<16x32xf32> to vector<16xf32>
    %10 = vector.shape_cast %9 : vector<16xf32> to vector<16x1xf32>
    %cst_8 = arith.constant 3.200000e+01 : f32
    %11 = vector.broadcast %cst_8 : f32 to vector<16x1xf32>
    %12 = arith.divf %10, %11 : vector<16x1xf32>
    %13 = arith.mulf %8, %8 : vector<16x32xf32>
    %cst_9 = arith.constant dense<0.000000e+00> : vector<16xf32>
    %14 = vector.multi_reduction <add>, %13, %cst_9 [1] : vector<16x32xf32> to vector<16xf32>
    %15 = vector.shape_cast %14 : vector<16xf32> to vector<16x1xf32>
    %cst_10 = arith.constant 3.200000e+01 : f32
    %16 = vector.broadcast %cst_10 : f32 to vector<16x1xf32>
    %17 = arith.divf %15, %16 : vector<16x1xf32>
    %18 = arith.mulf %12, %12 : vector<16x1xf32>
    %19 = arith.subf %17, %18 : vector<16x1xf32>
    %20 = vector.broadcast %12 : vector<16x1xf32> to vector<16x32xf32>
    %21 = arith.subf %8, %20 : vector<16x32xf32>
    %cst_11 = arith.constant 9.99999996E-13 : f32
    %22 = vector.broadcast %cst_11 : f32 to vector<16x1xf32>
    %23 = arith.addf %19, %22 : vector<16x1xf32>
    %24 = math.rsqrt %23 : vector<16x1xf32>
    %25 = vector.broadcast %24 : vector<16x1xf32> to vector<16x32xf32>
    %26 = arith.mulf %21, %25 : vector<16x32xf32>
    %c0_12 = arith.constant 0 : index
    %c0_13 = arith.constant 0 : index
    %27 = vector.load %arg5[%c0_12, %c0_13] : memref<1x32xf32, #tpu.memory_space<vmem>>, vector<1x32xf32>
    %28 = vector.broadcast %27 : vector<1x32xf32> to vector<16x32xf32>
    %29 = arith.mulf %26, %28 : vector<16x32xf32>
    %c0_14 = arith.constant 0 : index
    %c0_15 = arith.constant 0 : index
    %30 = vector.load %arg6[%c0_14, %c0_15] : memref<1x32xf32, #tpu.memory_space<vmem>>, vector<1x32xf32>
    %31 = vector.broadcast %30 : vector<1x32xf32> to vector<16x32xf32>
    %32 = arith.addf %29, %31 : vector<16x32xf32>
    %c0_16 = arith.constant 0 : index
    %c0_17 = arith.constant 0 : index
    %33 = vector.load %arg7[%c0_16, %c0_17] : memref<16x32xf32, #tpu.memory_space<vmem>>, vector<16x32xf32>
    tpu.vector_store %arg7[%c0_16, %c0_17], %32 {strides = array<i32>} : memref<16x32xf32, #tpu.memory_space<vmem>>, vector<16x32xf32>,
    return
  }
  func.func @transform_0(%arg0: i32) -> (i32, i32) {
    %c0_i32 = arith.constant 0 : i32
    %c0_i32_0 = arith.constant 0 : i32
    return %arg0, %c0_i32 : i32, i32
  }
  func.func @transform_1(%arg0: i32) -> (i32, i32) {
    %c0_i32 = arith.constant 0 : i32
    %c0_i32_0 = arith.constant 0 : i32
    return %arg0, %c0_i32 : i32, i32
  }
  func.func @transform_2(%arg0: i32) -> (i32, i32) {
    %c0_i32 = arith.constant 0 : i32
    %c0_i32_0 = arith.constant 0 : i32
    %c0_i32_1 = arith.constant 0 : i32
    return %c0_i32, %c0_i32_0 : i32, i32
  }
  func.func @transform_3(%arg0: i32) -> (i32, i32) {
    %c0_i32 = arith.constant 0 : i32
    %c0_i32_0 = arith.constant 0 : i32
    %c0_i32_1 = arith.constant 0 : i32
    return %c0_i32, %c0_i32_0 : i32, i32
  }
  func.func @transform_4(%arg0: i32) -> (i32, i32) {
    %c0_i32 = arith.constant 0 : i32
    %c0_i32_0 = arith.constant 0 : i32
    %c0_i32_1 = arith.constant 0 : i32
    return %c0_i32, %c0_i32_0 : i32, i32
  }
  func.func @transform_5(%arg0: i32) -> (i32, i32) {
    %c0_i32 = arith.constant 0 : i32
    %c0_i32_0 = arith.constant 0 : i32
    %c0_i32_1 = arith.constant 0 : i32
    return %c0_i32, %c0_i32_0 : i32, i32
  }
  func.func @transform_6(%arg0: i32) -> (i32, i32) {
    %c0_i32 = arith.constant 0 : i32
    %c0_i32_0 = arith.constant 0 : i32
    return %arg0, %c0_i32 : i32, i32
  }
}

</mosaic_0001>

<bundles_post_ra>
// kernel: tpu_custom_call.1
= control target key start
LH: loop header
LB: loop body
LE: loop exit
PB: predicated region body
PF: predicated region fallthrough
CT: control target
= control target key end

     0   :  { %v306_v1 = vmov 0.0   ;;  %vm307_vm0 = vmmov 0   ;;  %s403_s0 = inlined_call_operand.vmem [shape: bf16[16,128], index: 0, kind: input, shape index: {}]   ;;  %s404_s1 = inlined_call_operand.vmem [shape: bf16[16,32], index: 1, kind: input, shape index: {}]   ;;  %s405_s2 = inlined_call_operand.vmem [shape: bf16[128,32], index: 2, kind: input, shape index: {}]   ;;  %s406_s3 = inlined_call_operand.vmem [shape: f32[1,32], index: 3, kind: input, shape index: {}]   ;;  %s407_s4 = inlined_call_operand.vmem [shape: f32[1,32], index: 4, kind: input, shape index: {}]   ;;  %s408_s5 = inlined_call_operand.vmem [shape: f32[1,32], index: 5, kind: input, shape index: {}]   ;;  %s409_s6 = inlined_call_operand.hbm [shape: f32[16,32], index: 6, kind: output, shape index: {}]  }
   0x1   :  { %v269_v0 = vld [vmem:[%s405_s2] sm:$0xff]   ;;  %244 = vmatprep.subr.bf16.mxu0 %v306_v1  ;;  %v270_v2 = vld [vmem:[%s405_s2 + $0x8] sm:$0xff]   ;;  %260 = vmatprep.mubr.msk.bf16.mxu0 %vm307_vm0, %v306_v1  ;;  %v271_v3 = vld [vmem:[%s405_s2 + $0x10] sm:$0xff]  }
   0x2   :  { %245 = vmatpush3.bf16.msra.mxu0 %v269_v0 }
   0x3   :  { %246 = vmatprep.subr.bf16.mxu0 %v306_v1 }
   0x6   :  { %247 = vmatpush3.bf16.msra.mxu0 %v270_v2 }
   0x7   :  { %248 = vmatprep.subr.bf16.mxu0 %v306_v1 }
   0x8   :  { %11 = vsyncpa [#allocation3], 0  ;;  %v272_v4 = vld [vmem:[%s405_s2 + $0x18] sm:$0xff]   ;;  %v273_v5 = vld [vmem:[%s405_s2 + $0x20] sm:$0xff]   ;;  %vm151_vm1 = vcmask 261120   ;;  %s308_s19 = smov [#allocation2]  }
   0x9   :  { %v274_v6 = vld [vmem:[%s405_s2 + $0x28] sm:$0xff]   ;;  %v275_v7 = vld [vmem:[%s405_s2 + $0x30] sm:$0xff]   ;;  %v276_v8 = vld [vmem:[%s405_s2 + $0x38] sm:$0xff]   ;;  %s208_s20 = sshll.u32 %s308_s19, 4  ;;  %s209_s20 = int_to_ptr.vmem [resolvable:$true] %s208_s20 }
   0xa   :  { %249 = vmatpush3.bf16.msra.mxu0 %v271_v3  ;;  %v277_v9 = vld [vmem:[%s403_s0] sm:$0xff]   ;;  %p287_p1 = scmp.lt.s32.totalorder %s209_s20, %s209_s20 }
   0xb   :  { %250 = vmatprep.subr.bf16.mxu0 %v306_v1  ;;  %v232_v10 = vld [vmem:[%s404_s1] sm:$0xff]  }
   0xc   :  { %v219_v11 = vld [vmem:[%s406_s3] ss:$0 sm:$0xff]  ;;  %v233_v12 = vunpack.c.l.bf16 %v232_v10  ;;  %v234_v16 = vunpack.c.h.bf16 %v232_v10 }
   0xd   :  { %v229_v44 = vld [vmem:[%s407_s4] ss:$0 sm:$0xff]  ;;  %s282_s4 = scalar_lea.vmem %s209_s20, 256 }
   0xe   :  { %251 = vmatpush3.bf16.msra.mxu0 %v272_v4  ;;  %v230_v46 = vld [vmem:[%s408_s5] ss:$0 sm:$0xff]  ;;  %p283_p0 = scmp.ne.s32.totalorder %s209_s20, %s282_s4  ;;  %p288_p2 = scmp.lt.s32.totalorder %s282_s4, %s282_s4 }
   0xf   :  { %252 = vmatprep.subr.bf16.mxu0 %v306_v1 }
  0x10   :  { %p289_p3 = por %p288_p2, %p287_p1 }
  0x12   :  { %253 = vmatpush3.bf16.msra.mxu0 %v273_v5  ;;  %p290_p4 = pnand %p289_p3, %p283_p0 }
  0x13   :  { %254 = vmatprep.subr.bf16.mxu0 %v306_v1 }
  0x16   :  { %255 = vmatpush3.bf16.msra.mxu0 %v274_v6 }
  0x17   :  { %256 = vmatprep.subr.bf16.mxu0 %v306_v1 }
  0x1a   :  { %257 = vmatpush3.bf16.msra.mxu0 %v275_v7 }
  0x1b   :  { %258 = vmatprep.subr.bf16.mxu0 %v306_v1 }
  0x1e   :  { %259 = vmatpush3.bf16.msra.mxu0 %v276_v8 }
  0x21   :  { %261 = vmatmul.mubr.bf16.vlgmr.msra.gmra.mrb[0].mxu0 %v277_v9 }
  0xf4   :  { %v138_v13 = vpop.f32.mrb[0].mxu0 }
  0xf5   :  { %v139_v14 = vadd.f32 %v219_v11, %v138_v13  ;;  %v262_v15 = vpop.f32.mrb[1].mxu0 }
  0xf6   :  { %v141_v17 = vpop.f32.mrb[2].mxu0 }
  0xf7   :  { %v149_v18 = vadd.f32 %v233_v12, %v139_v14  ;;  %v142_v19 = vadd.f32 %v219_v11, %v141_v17  ;;  %v263_v20 = vpop.f32.mrb[3].mxu0 }
  0xf9   :  { %v150_v21 = vadd.f32 %v234_v16, %v142_v19  ;;  %v152_v22 = vsel %vm151_vm1, %v149_v18, 0.0  ;;  %v161_v23 = vmul.f32 %v149_v18, %v149_v18 }
  0xfa   :  { %153 = vadd.xlane.f32.xlu0 %v152_v22 }
  0xfb   :  { %v163_v24 = vsel %vm151_vm1, %v161_v23, 0.0  ;;  %v162_v25 = vmul.f32 %v150_v21, %v150_v21  ;;  %v155_v26 = vsel %vm151_vm1, %v150_v21, 0.0 }
  0xfc   :  { %164 = vadd.xlane.f32.xlu1 %v163_v24 }
  0xfd   :  { %v166_v27 = vsel %vm151_vm1, %v162_v25, 0.0 }
  0xfe   :  { %156 = vadd.xlane.f32.xlu0 %v155_v26 }
 0x100   :  { %167 = vadd.xlane.f32.xlu1 %v166_v27 }
 0x187   :  { %v154_v28 = vpop.xlane.xlu0 %153 }
 0x188   :  { %v159_v29 = vmul.f32 0.03125, %v154_v28 }
 0x189   :  { %v165_v30 = vpop.xlane.xlu1 %164 }
 0x18a   :  { %v171_v31 = vmul.f32 %v159_v29, %v159_v29  ;;  %v169_v32 = vmul.f32 0.03125, %v165_v30  ;;  %v175_v42 = vsub.f32 %v149_v18, %v159_v29 }
 0x18b   :  { %v157_v33 = vpop.xlane.xlu0 %156 }
 0x18c   :  { %v173_v34 = vsub.f32 %v169_v32, %v171_v31  ;;  %v160_v35 = vmul.f32 0.03125, %v157_v33 }
 0x18d   :  { %v168_v36 = vpop.xlane.xlu1 %167 }
 0x18e   :  { %v177_v37 = vadd.f32 1e-12, %v173_v34  ;;  %v172_v38 = vmul.f32 %v160_v35, %v160_v35  ;;  %v170_v39 = vmul.f32 0.03125, %v168_v36  ;;  %v176_v47 = vsub.f32 %v150_v21, %v160_v35 }
 0x190   :  { %278 = vrsqrt.f32 %v177_v37  ;;  %v174_v40 = vsub.f32 %v170_v39, %v172_v38 }
 0x192   :  { %v178_v41 = vadd.f32 1e-12, %v174_v40 }
 0x194   :  { %280 = vrsqrt.f32 %v178_v41 }
 0x19a   :  { %v279_v43 = vpop.eup %278 }
 0x19b   :  { %v181_v45 = vmul.f32 %v279_v43, %v175_v42 }
 0x19d   :  { %v190_v48 = vmul.f32 %v229_v44, %v181_v45 }
 0x19e   :  { %v281_v49 = vpop.eup %280 }
 0x19f   :  { %v182_v50 = vmul.f32 %v281_v49, %v176_v47  ;;  %v199_v51 = vadd.f32 %v230_v46, %v190_v48 }
 0x1a1   :  { %v191_v52 = vmul.f32 %v229_v44, %v182_v50  ;;  %201 = vst.msk [vmem:[#allocation2] sm:$0xff] %vm151_vm1, %v199_v51 }
 0x1a3   :  { %v200_v53 = vadd.f32 %v230_v46, %v191_v52 }
 0x1a5   :  { %202 = vst.msk [vmem:[#allocation2 + $0x8] sm:$0xff] %vm151_vm1, %v200_v53 }
 0x1a6   :  { %293 = shalt.err (!%p290_p4)
}
 0x1a7   :  { %s294_s22 = scalar_lea.hbm %s409_s6, 256 }
 0x1a8   :  { %p295_p5 = scmp.ne.s32.totalorder %s409_s6, %s294_s22  ;;  %p298_p6 = scmp.lt.u32.totalorder %s294_s22, %s409_s6 }
 0x1aa   :  { %p300_p7 = pnand %p298_p6, %p295_p5 }
 0x1ac   :  { %303 = shalt.err (!%p300_p7)
}
 0x1ad   :  { %s309_s27 = smov 128   ;;  %s310_s28 = smov 8  }
 0x1ae   :  { %214 = dma.vmem_to_hbm [thread:$0]  %s209_s20, 256, %s409_s6, [#allocation3], %s309_s27, %s309_s27, %s310_s28  }
 0x1af   :  { %304 = dma.done.wait [#allocation3], 256  }
 0x1b0   :  { %305 = vsyncadd [#allocation3], 4294967040 }
 0x1b1   :  { %218 = vsyncpa [#allocation3], 1 }

</bundles_post_ra>
